<compile_context>
chip_gen: v7x
topology: tpu7x:2x2x1
jax: 0.10.0
libtpu: 0.0.40
codegen_flags: <defaults>
</compile_context>

<pallas_src>
import functools

import jax
import jax.numpy as jnp
from jax.experimental import pallas as pl
from jax.experimental.pallas import tpu as pltpu


# ----------------------------- in-kernel math -----------------------------

_INV_SQRT2 = 0.7071067811865476


def _erf(x):
    # Abramowitz & Stegun 7.1.26, |err| <= 1.5e-7 — matches the exact-erf GELU of
    # torch.nn.GELU to well below the check tolerance using only exp/mul/add.
    ax = jnp.abs(x)
    t = 1.0 / (1.0 + 0.3275911 * ax)
    poly = ((((1.061405429 * t - 1.453152027) * t + 1.421413741) * t
             - 0.284496736) * t + 0.254829592) * t
    y = 1.0 - poly * jnp.exp(-ax * ax)
    return jnp.where(x < 0.0, -y, y)


def _gelu(x):
    # Exact-erf GELU (PyTorch nn.GELU default), computed in f32.
    return 0.5 * x * (1.0 + _erf(x * _INV_SQRT2))


def _layer_norm(x, gamma, beta, eps=1e-5):
    mean = jnp.mean(x, axis=-1, keepdims=True)
    xc = x - mean
    var = jnp.mean(xc * xc, axis=-1, keepdims=True)
    return xc * jax.lax.rsqrt(var + eps) * gamma + beta


def _softmax(x, exact):
    m = jnp.max(x, axis=-1, keepdims=True)
    e = jnp.exp(x - m)
    s = jnp.sum(e, axis=-1, keepdims=True)
    if exact:
        return e / s                                # bit-faithful on the f32 path
    return e * pl.reciprocal(s, approx=True)        # EUP divide on the fast path


# ------------------------------- the kernel -------------------------------

def block_kernel(src_ref,
                 ln1_g, ln1_b, w_qkv, b_qkv, w_out, b_out,
                 ln2_g, ln2_b, w_fc1, b_fc1, w_fc2, b_fc2,
                 out_ref, *, num_heads, compute_dtype):
    Bt, L, D = src_ref.shape
    H = num_heads
    dh = D // H
    exact = jnp.dtype(compute_dtype) == jnp.float32

    x = src_ref[...].astype(jnp.float32).reshape(Bt * L, D)            # (M, D)

    # ---- norm1 ----
    h = _layer_norm(x, ln1_g[...], ln1_b[...])

    # ---- fused QKV projection: one lane-dense (M, D) x (D, 3D) matmul.
    #      1/sqrt(dh) is pre-folded into the Q columns / bias host-side. ----
    qkv = jnp.dot(h.astype(compute_dtype), w_qkv[...],
                  preferred_element_type=jnp.float32) + b_qkv[...]     # (M, 3D) f32

    def split_heads(z):            # (M, D) f32 -> (Bt*H, L, dh) compute_dtype
        z = z.reshape(Bt, L, H, dh)
        z = jnp.swapaxes(z, 1, 2)                                      # (Bt, H, L, dh)
        return z.reshape(Bt * H, L, dh).astype(compute_dtype)

    q = split_heads(qkv[:, 0 * D:1 * D])
    k = split_heads(qkv[:, 1 * D:2 * D])
    v = split_heads(qkv[:, 2 * D:3 * D])

    # ---- attention: compute_dtype matmul operands, f32 scores / softmax ----
    # TODO(synk): flash-style query tiling for large L (avoids the L^2 VMEM term).
    scores = jnp.einsum("bqd,bkd->bqk", q, k,
                        preferred_element_type=jnp.float32)            # (Bt*H, L, L)
    probs = _softmax(scores, exact)
    ctx = jnp.einsum("bqk,bkd->bqd", probs.astype(compute_dtype), v,
                     preferred_element_type=jnp.float32)               # (Bt*H, L, dh)

    # Concat heads back to (M, D); single output projection — the head reduction
    # happens inside the MXU contraction (K = D), no (H, L, D) intermediate.
    ctx = jnp.swapaxes(ctx.reshape(Bt, H, L, dh), 1, 2)                # (Bt, L, H, dh)
    ctx = ctx.reshape(Bt * L, D).astype(compute_dtype)
    attn = jnp.dot(ctx, w_out[...],
                   preferred_element_type=jnp.float32) + b_out[...]    # (M, D)

    # ---- residual 1 (DropPath = identity in eval) ----
    x = x + attn

    # ---- norm2 + MLP (exact-erf GELU in f32) ----
    m = _layer_norm(x, ln2_g[...], ln2_b[...]).astype(compute_dtype)
    m = jnp.dot(m, w_fc1[...], preferred_element_type=jnp.float32) + b_fc1[...]
    m = _gelu(m)
    m = jnp.dot(m.astype(compute_dtype), w_fc2[...],
                preferred_element_type=jnp.float32) + b_fc2[...]       # (M, D)

    # ---- residual 2 ----
    out_ref[...] = (x + m).reshape(Bt, L, D).astype(out_ref.dtype)


# ------------------------------ host wrapper -------------------------------

def block_forward(src, params, *, dim, num_heads, compute_dtype=jnp.bfloat16,
                  block_batch=None):
    B, L, D = src.shape
    assert D == dim and dim % num_heads == 0
    H = num_heads
    dh = dim // H
    hidden = params["w_fc1"].shape[1]
    scale = 1.0 / float(dh) ** 0.5

    # ---- host-side weight prep: fold 1/sqrt(dh) into the Q slice of the fused
    #      in-projection; cast matmul operands to compute_dtype. ----
    q_col_scale = jnp.concatenate(
        [jnp.full((1, D), scale, jnp.float32), jnp.ones((1, 2 * D), jnp.float32)],
        axis=1)
    w_qkv = (params["w_in"] * q_col_scale).astype(compute_dtype)       # (D, 3D)
    b_qkv = (params["b_in"] * q_col_scale).astype(jnp.float32)         # (1, 3D)
    w_out = params["w_out"].astype(compute_dtype)                      # (D, D)
    b_out = params["b_out"].astype(jnp.float32)
    w_fc1 = params["w_fc1"].astype(compute_dtype)
    b_fc1 = params["b_fc1"].astype(jnp.float32)
    w_fc2 = params["w_fc2"].astype(compute_dtype)
    b_fc2 = params["b_fc2"].astype(jnp.float32)
    ln1_g = params["ln1_g"].astype(jnp.float32)
    ln1_b = params["ln1_b"].astype(jnp.float32)
    ln2_g = params["ln2_g"].astype(jnp.float32)
    ln2_b = params["ln2_b"].astype(jnp.float32)

    weight_args = (ln1_g, ln1_b, w_qkv, b_qkv, w_out, b_out,
                   ln2_g, ln2_b, w_fc1, b_fc1, w_fc2, b_fc2)
    weight_bytes = sum(int(w.size) * w.dtype.itemsize for w in weight_args)

    # ---- per-generation VMEM budget (v5e/v6e: 128 MiB, v7x: 64 MiB/TC) ----
    try:
        vmem_cap = int(pltpu.get_tpu_info().vmem_capacity_bytes)
    except Exception:                         # conservative fallback
        vmem_cap = 64 * 2 ** 20
    vmem_limit = max(32 * 2 ** 20, vmem_cap - max(8 * 2 ** 20, vmem_cap // 8))

    cbytes = jnp.dtype(compute_dtype).itemsize

    def act_bytes(bt):   # rough upper bound on live in-kernel activations
        rows = bt * L
        return int(rows * D * 4 * 4                  # x, h, attn, out (f32)
                   + rows * 3 * D * (4 + cbytes)     # qkv + head-split copies
                   + 3 * bt * H * L * L * 4          # scores, probs (+ cast)
                   + rows * D * (4 + cbytes)         # ctx
                   + rows * hidden * (4 + cbytes))   # mlp hidden

    # ---- pick the batch tile: enough rows to fill the MXU (~256), keep >= 2
    #      grid steps when possible (v7x 2 TCs), stay inside the VMEM budget. ----
    if block_batch is None:
        bt = max(1, min(B, pl.cdiv(256, L)))
        if B >= 2:
            bt = max(1, min(bt, B // 2))             # keep >=2 parallel grid steps
        while B % bt:
            bt -= 1
        budget = int(0.6 * vmem_limit) - weight_bytes
        while bt > 1 and act_bytes(bt) + 4 * bt * L * D * src.dtype.itemsize > budget:
            bt -= 1
            while B % bt:
                bt -= 1
    else:
        bt = int(block_batch)
        assert B % bt == 0

    kernel = functools.partial(block_kernel, num_heads=H,
                               compute_dtype=compute_dtype)

    # Weights ride as whole-array single-buffered VMEM operands; only the src/out
    # blocks are pipelined through the grid.
    vmem_spec = pl.BlockSpec(memory_space=pltpu.MemorySpace.VMEM)
    in_specs = [pl.BlockSpec((bt, L, D), lambda b: (b, 0, 0))]
    in_specs += [vmem_spec] * len(weight_args)

    return pl.pallas_call(
        kernel,
        out_shape=jax.ShapeDtypeStruct((B, L, D), src.dtype),
        grid=(B // bt,),
        in_specs=in_specs,
        out_specs=pl.BlockSpec((bt, L, D), lambda b: (b, 0, 0)),
        compiler_params=pltpu.CompilerParams(
            dimension_semantics=("parallel",),
            vmem_limit_bytes=int(vmem_limit),
        ),
    )(src, *weight_args)


# ------------------------- pure-JAX reference check ------------------------

def block_reference(src, params, *, dim, num_heads):
    def ln(x, g, b):
        mean = jnp.mean(x, axis=-1, keepdims=True)
        var = jnp.mean((x - mean) ** 2, axis=-1, keepdims=True)
        return (x - mean) / jnp.sqrt(var + 1e-5) * g + b

    B, L, D = src.shape
    d_head = dim // num_heads
    h = ln(src, params["ln1_g"], params["ln1_b"])
    qkv = h @ params["w_in"] + params["b_in"]
    q, k, v = jnp.split(qkv, 3, axis=-1)
    q = q.reshape(B, L, num_heads, d_head).transpose(0, 2, 1, 3)
    k = k.reshape(B, L, num_heads, d_head).transpose(0, 2, 1, 3)
    v = v.reshape(B, L, num_heads, d_head).transpose(0, 2, 1, 3)
    scores = jnp.einsum("bhqd,bhkd->bhqk", q, k) / (d_head ** 0.5)
    probs = jax.nn.softmax(scores, axis=-1)
    attn = jnp.einsum("bhqk,bhkd->bhqd", probs, v).transpose(0, 2, 1, 3).reshape(B, L, D)
    attn = attn @ params["w_out"] + params["b_out"]
    x = src + attn
    h2 = ln(x, params["ln2_g"], params["ln2_b"])
    h2 = h2 @ params["w_fc1"] + params["b_fc1"]
    h2 = jax.nn.gelu(h2, approximate=False)
    h2 = h2 @ params["w_fc2"] + params["b_fc2"]
    return x + h2


# ---------------------------------- main -----------------------------------

if __name__ == "__main__":
    B, L, D, H = 2, 8, 32, 4
    hidden = int(D * 4.0)

    key = jax.random.PRNGKey(0)
    ks = jax.random.split(key, 9)

    # Shapes match nn.MultiheadAttention (bias=True, add_bias_kv=False) + Mlp(4*dim).
    params = {
        "ln1_g": jnp.ones((1, D), jnp.float32),
        "ln1_b": jnp.zeros((1, D), jnp.float32),
        # in_proj_weight is (3D, D) in torch; stored pre-transposed as (D, 3D).
        "w_in": 0.05 * jax.random.normal(ks[0], (D, 3 * D), jnp.float32),
        "b_in": 0.01 * jax.random.normal(ks[1], (1, 3 * D), jnp.float32),
        "w_out": 0.05 * jax.random.normal(ks[2], (D, D), jnp.float32),
        "b_out": 0.01 * jax.random.normal(ks[3], (1, D), jnp.float32),
        "ln2_g": jnp.ones((1, D), jnp.float32),
        "ln2_b": jnp.zeros((1, D), jnp.float32),
        "w_fc1": 0.05 * jax.random.normal(ks[4], (D, hidden), jnp.float32),
        "b_fc1": 0.01 * jax.random.normal(ks[5], (1, hidden), jnp.float32),
        "w_fc2": 0.05 * jax.random.normal(ks[6], (hidden, D), jnp.float32),
        "b_fc2": 0.01 * jax.random.normal(ks[7], (1, D), jnp.float32),
    }

    src = jax.random.normal(ks[8], (B, L, D), jnp.float32)

    ref = block_reference(src, params, dim=D, num_heads=H)

    # f32 MXU path: tight check against the exact reference.
    out_f32 = jax.block_until_ready(
        block_forward(src, params, dim=D, num_heads=H, compute_dtype=jnp.float32))
    assert out_f32.shape == (B, L, D)
    err_f32 = float(jnp.max(jnp.abs(out_f32 - ref)))
    assert jnp.allclose(out_f32, ref, rtol=2e-3, atol=2e-3), err_f32

    # bf16 MXU path (default / fast): looser check due to bf16 operand rounding.
    out_bf16 = jax.block_until_ready(
        block_forward(src, params, dim=D, num_heads=H, compute_dtype=jnp.bfloat16))
    assert out_bf16.shape == (B, L, D)
    err_bf16 = float(jnp.max(jnp.abs(out_bf16 - ref)))
    assert jnp.allclose(out_bf16, ref, rtol=2e-2, atol=2e-2), err_bf16

    print("KERNEL_OK")
</pallas_src>

<mosaic_0001>
module attributes {stable_mosaic.version = 11 : i64} {
  func.func @block_kernel(%arg0: i32, %arg1: memref<1x8x32xf32, #tpu.memory_space<vmem>>, %arg2: memref<1x32xf32, #tpu.memory_space<vmem>>, %arg3: memref<1x32xf32, #tpu.memory_space<vmem>>, %arg4: memref<32x96xf32, #tpu.memory_space<vmem>>, %arg5: memref<1x96xf32, #tpu.memory_space<vmem>>, %arg6: memref<32x32xf32, #tpu.memory_space<vmem>>, %arg7: memref<1x32xf32, #tpu.memory_space<vmem>>, %arg8: memref<1x32xf32, #tpu.memory_space<vmem>>, %arg9: memref<1x32xf32, #tpu.memory_space<vmem>>, %arg10: memref<32x128xf32, #tpu.memory_space<vmem>>, %arg11: memref<1x128xf32, #tpu.memory_space<vmem>>, %arg12: memref<128x32xf32, #tpu.memory_space<vmem>>, %arg13: memref<1x32xf32, #tpu.memory_space<vmem>>, %arg14: memref<1x8x32xf32, #tpu.memory_space<vmem>>) attributes {dimension_semantics = [#tpu.dimension_semantics<parallel>], iteration_bounds = array<i64: 2>, scalar_prefetch = 0 : i64, scratch_operands = 0 : i64, tpu.core_type = #tpu.core_type<tc>, window_params = [{transform_indices = @transform_0, window_bounds = array<i64: 1, 8, 32>}, {pipeline_mode = #tpu.pipeline_mode<synchronous>, transform_indices = @transform_1, window_bounds = array<i64: 1, 32>}, {pipeline_mode = #tpu.pipeline_mode<synchronous>, transform_indices = @transform_2, window_bounds = array<i64: 1, 32>}, {pipeline_mode = #tpu.pipeline_mode<synchronous>, transform_indices = @transform_3, window_bounds = array<i64: 32, 96>}, {pipeline_mode = #tpu.pipeline_mode<synchronous>, transform_indices = @transform_4, window_bounds = array<i64: 1, 96>}, {pipeline_mode = #tpu.pipeline_mode<synchronous>, transform_indices = @transform_5, window_bounds = array<i64: 32, 32>}, {pipeline_mode = #tpu.pipeline_mode<synchronous>, transform_indices = @transform_6, window_bounds = array<i64: 1, 32>}, {pipeline_mode = #tpu.pipeline_mode<synchronous>, transform_indices = @transform_7, window_bounds = array<i64: 1, 32>}, {pipeline_mode = #tpu.pipeline_mode<synchronous>, transform_indices = @transform_8, window_bounds = array<i64: 1, 32>}, {pipeline_mode = #tpu.pipeline_mode<synchronous>, transform_indices = @transform_9, window_bounds = array<i64: 32, 128>}, {pipeline_mode = #tpu.pipeline_mode<synchronous>, transform_indices = @transform_10, window_bounds = array<i64: 1, 128>}, {pipeline_mode = #tpu.pipeline_mode<synchronous>, transform_indices = @transform_11, window_bounds = array<i64: 128, 32>}, {pipeline_mode = #tpu.pipeline_mode<synchronous>, transform_indices = @transform_12, window_bounds = array<i64: 1, 32>}, {transform_indices = @transform_13, window_bounds = array<i64: 1, 8, 32>}]} {
    %c0 = arith.constant 0 : index
    %c0_0 = arith.constant 0 : index
    %c0_1 = arith.constant 0 : index
    %0 = vector.load %arg1[%c0, %c0_0, %c0_1] : memref<1x8x32xf32, #tpu.memory_space<vmem>>, vector<1x8x32xf32>
    %1 = vector.shape_cast %0 : vector<1x8x32xf32> to vector<8x32xf32>
    %c0_2 = arith.constant 0 : index
    %c0_3 = arith.constant 0 : index
    %2 = vector.load %arg2[%c0_2, %c0_3] : memref<1x32xf32, #tpu.memory_space<vmem>>, vector<1x32xf32>
    %c0_4 = arith.constant 0 : index
    %c0_5 = arith.constant 0 : index
    %3 = vector.load %arg3[%c0_4, %c0_5] : memref<1x32xf32, #tpu.memory_space<vmem>>, vector<1x32xf32>
    %cst = arith.constant dense<0.000000e+00> : vector<8xf32>
    %4 = vector.multi_reduction <add>, %1, %cst [1] : vector<8x32xf32> to vector<8xf32>
    %5 = vector.shape_cast %4 : vector<8xf32> to vector<8x1xf32>
    %cst_6 = arith.constant 3.200000e+01 : f32
    %6 = vector.broadcast %cst_6 : f32 to vector<8x1xf32>
    %7 = arith.divf %5, %6 : vector<8x1xf32>
    %8 = vector.broadcast %7 : vector<8x1xf32> to vector<8x32xf32>
    %9 = arith.subf %1, %8 : vector<8x32xf32>
    %10 = arith.mulf %9, %9 : vector<8x32xf32>
    %cst_7 = arith.constant dense<0.000000e+00> : vector<8xf32>
    %11 = vector.multi_reduction <add>, %10, %cst_7 [1] : vector<8x32xf32> to vector<8xf32>
    %12 = vector.shape_cast %11 : vector<8xf32> to vector<8x1xf32>
    %cst_8 = arith.constant 3.200000e+01 : f32
    %13 = vector.broadcast %cst_8 : f32 to vector<8x1xf32>
    %14 = arith.divf %12, %13 : vector<8x1xf32>
    %cst_9 = arith.constant 9.99999974E-6 : f32
    %15 = vector.broadcast %cst_9 : f32 to vector<8x1xf32>
    %16 = arith.addf %14, %15 : vector<8x1xf32>
    %17 = math.rsqrt %16 : vector<8x1xf32>
    %18 = vector.broadcast %17 : vector<8x1xf32> to vector<8x32xf32>
    %19 = arith.mulf %9, %18 : vector<8x32xf32>
    %20 = vector.broadcast %2 : vector<1x32xf32> to vector<8x32xf32>
    %21 = arith.mulf %19, %20 : vector<8x32xf32>
    %22 = vector.broadcast %3 : vector<1x32xf32> to vector<8x32xf32>
    %23 = arith.addf %21, %22 : vector<8x32xf32>
    %c0_10 = arith.constant 0 : index
    %c0_11 = arith.constant 0 : index
    %24 = vector.load %arg4[%c0_10, %c0_11] : memref<32x96xf32, #tpu.memory_space<vmem>>, vector<32x96xf32>
    %cst_12 = arith.constant dense<0.000000e+00> : vector<8x96xf32>
    %25 = tpu.matmul %23, %24, %cst_12 {dimension_numbers = #tpu.dot_dimension_numbers<[1], [0], [0], [1], [0, 0, 1, 1], [], []>} : vector<8x32xf32>, vector<32x96xf32>, vector<8x96xf32> -> vector<8x96xf32>
    %c0_13 = arith.constant 0 : index
    %c0_14 = arith.constant 0 : index
    %26 = vector.load %arg5[%c0_13, %c0_14] : memref<1x96xf32, #tpu.memory_space<vmem>>, vector<1x96xf32>
    %27 = vector.broadcast %26 : vector<1x96xf32> to vector<8x96xf32>
    %28 = arith.addf %25, %27 : vector<8x96xf32>
    %29 = vector.extract_strided_slice %28 {offsets = [0, 0], sizes = [8, 32], strides = [1, 1]} : vector<8x96xf32> to vector<8x32xf32>
    %30 = vector.shape_cast %29 : vector<8x32xf32> to vector<1x8x4x8xf32>
    %31 = tpu.transpose %30, [0, 2, 1, 3] : vector<1x8x4x8xf32> -> vector<1x4x8x8xf32>
    %32 = vector.shape_cast %31 : vector<1x4x8x8xf32> to vector<4x8x8xf32>
    %33 = vector.extract_strided_slice %28 {offsets = [0, 32], sizes = [8, 32], strides = [1, 1]} : vector<8x96xf32> to vector<8x32xf32>
    %34 = vector.shape_cast %33 : vector<8x32xf32> to vector<1x8x4x8xf32>
    %35 = tpu.transpose %34, [0, 2, 1, 3] : vector<1x8x4x8xf32> -> vector<1x4x8x8xf32>
    %36 = vector.shape_cast %35 : vector<1x4x8x8xf32> to vector<4x8x8xf32>
    %37 = vector.extract_strided_slice %28 {offsets = [0, 64], sizes = [8, 32], strides = [1, 1]} : vector<8x96xf32> to vector<8x32xf32>
    %38 = vector.shape_cast %37 : vector<8x32xf32> to vector<1x8x4x8xf32>
    %39 = tpu.transpose %38, [0, 2, 1, 3] : vector<1x8x4x8xf32> -> vector<1x4x8x8xf32>
    %40 = vector.shape_cast %39 : vector<1x4x8x8xf32> to vector<4x8x8xf32>
    "tpu.trace_start"() <{level = 10 : i32, message = "bqd,bkd->bqk"}> : () -> ()
    %cst_15 = arith.constant dense<0.000000e+00> : vector<4x8x8xf32>
    %41 = tpu.matmul %32, %36, %cst_15 {dimension_numbers = #tpu.dot_dimension_numbers<[2], [2], [1], [1], [0, 0, 0, 1, 1, 1], [0], [0]>} : vector<4x8x8xf32>, vector<4x8x8xf32>, vector<4x8x8xf32> -> vector<4x8x8xf32>
    "tpu.trace_stop"() : () -> ()
    %cst_16 = arith.constant dense<0xFF800000> : vector<4x8xf32>
    %42 = vector.multi_reduction <maximumf>, %41, %cst_16 [2] : vector<4x8x8xf32> to vector<4x8xf32>
    %43 = vector.shape_cast %42 : vector<4x8xf32> to vector<4x8x1xf32>
    %44 = vector.broadcast %43 : vector<4x8x1xf32> to vector<4x8x8xf32>
    %45 = arith.subf %41, %44 : vector<4x8x8xf32>
    %46 = math.exp %45 : vector<4x8x8xf32>
    %cst_17 = arith.constant dense<0.000000e+00> : vector<4x8xf32>
    %47 = vector.multi_reduction <add>, %46, %cst_17 [2] : vector<4x8x8xf32> to vector<4x8xf32>
    %48 = vector.shape_cast %47 : vector<4x8xf32> to vector<4x8x1xf32>
    %49 = vector.broadcast %48 : vector<4x8x1xf32> to vector<4x8x8xf32>
    %50 = arith.divf %46, %49 : vector<4x8x8xf32>
    "tpu.trace_start"() <{level = 10 : i32, message = "bqk,bkd->bqd"}> : () -> ()
    %cst_18 = arith.constant dense<0.000000e+00> : vector<4x8x8xf32>
    %51 = tpu.matmul %50, %40, %cst_18 {dimension_numbers = #tpu.dot_dimension_numbers<[2], [1], [1], [2], [0, 0, 0, 1, 1, 2], [0], [0]>} : vector<4x8x8xf32>, vector<4x8x8xf32>, vector<4x8x8xf32> -> vector<4x8x8xf32>
    "tpu.trace_stop"() : () -> ()
    %52 = vector.shape_cast %51 : vector<4x8x8xf32> to vector<1x4x8x8xf32>
    %53 = tpu.transpose %52, [0, 2, 1, 3] : vector<1x4x8x8xf32> -> vector<1x8x4x8xf32>
    %54 = vector.shape_cast %53 : vector<1x8x4x8xf32> to vector<8x32xf32>
    %c0_19 = arith.constant 0 : index
    %c0_20 = arith.constant 0 : index
    %55 = vector.load %arg6[%c0_19, %c0_20] : memref<32x32xf32, #tpu.memory_space<vmem>>, vector<32x32xf32>
    %cst_21 = arith.constant dense<0.000000e+00> : vector<8x32xf32>
    %56 = tpu.matmul %54, %55, %cst_21 {dimension_numbers = #tpu.dot_dimension_numbers<[1], [0], [0], [1], [0, 0, 1, 1], [], []>} : vector<8x32xf32>, vector<32x32xf32>, vector<8x32xf32> -> vector<8x32xf32>
    %c0_22 = arith.constant 0 : index
    %c0_23 = arith.constant 0 : index
    %57 = vector.load %arg7[%c0_22, %c0_23] : memref<1x32xf32, #tpu.memory_space<vmem>>, vector<1x32xf32>
    %58 = vector.broadcast %57 : vector<1x32xf32> to vector<8x32xf32>
    %59 = arith.addf %56, %58 : vector<8x32xf32>
    %60 = arith.addf %1, %59 : vector<8x32xf32>
    %c0_24 = arith.constant 0 : index
    %c0_25 = arith.constant 0 : index
    %61 = vector.load %arg8[%c0_24, %c0_25] : memref<1x32xf32, #tpu.memory_space<vmem>>, vector<1x32xf32>
    %c0_26 = arith.constant 0 : index
    %c0_27 = arith.constant 0 : index
    %62 = vector.load %arg9[%c0_26, %c0_27] : memref<1x32xf32, #tpu.memory_space<vmem>>, vector<1x32xf32>
    %cst_28 = arith.constant dense<0.000000e+00> : vector<8xf32>
    %63 = vector.multi_reduction <add>, %60, %cst_28 [1] : vector<8x32xf32> to vector<8xf32>
    %64 = vector.shape_cast %63 : vector<8xf32> to vector<8x1xf32>
    %cst_29 = arith.constant 3.200000e+01 : f32
    %65 = vector.broadcast %cst_29 : f32 to vector<8x1xf32>
    %66 = arith.divf %64, %65 : vector<8x1xf32>
    %67 = vector.broadcast %66 : vector<8x1xf32> to vector<8x32xf32>
    %68 = arith.subf %60, %67 : vector<8x32xf32>
    %69 = arith.mulf %68, %68 : vector<8x32xf32>
    %cst_30 = arith.constant dense<0.000000e+00> : vector<8xf32>
    %70 = vector.multi_reduction <add>, %69, %cst_30 [1] : vector<8x32xf32> to vector<8xf32>
    %71 = vector.shape_cast %70 : vector<8xf32> to vector<8x1xf32>
    %cst_31 = arith.constant 3.200000e+01 : f32
    %72 = vector.broadcast %cst_31 : f32 to vector<8x1xf32>
    %73 = arith.divf %71, %72 : vector<8x1xf32>
    %cst_32 = arith.constant 9.99999974E-6 : f32
    %74 = vector.broadcast %cst_32 : f32 to vector<8x1xf32>
    %75 = arith.addf %73, %74 : vector<8x1xf32>
    %76 = math.rsqrt %75 : vector<8x1xf32>
    %77 = vector.broadcast %76 : vector<8x1xf32> to vector<8x32xf32>
    %78 = arith.mulf %68, %77 : vector<8x32xf32>
    %79 = vector.broadcast %61 : vector<1x32xf32> to vector<8x32xf32>
    %80 = arith.mulf %78, %79 : vector<8x32xf32>
    %81 = vector.broadcast %62 : vector<1x32xf32> to vector<8x32xf32>
    %82 = arith.addf %80, %81 : vector<8x32xf32>
    %c0_33 = arith.constant 0 : index
    %c0_34 = arith.constant 0 : index
    %83 = vector.load %arg10[%c0_33, %c0_34] : memref<32x128xf32, #tpu.memory_space<vmem>>, vector<32x128xf32>
    %cst_35 = arith.constant dense<0.000000e+00> : vector<8x128xf32>
    %84 = tpu.matmul %82, %83, %cst_35 {dimension_numbers = #tpu.dot_dimension_numbers<[1], [0], [0], [1], [0, 0, 1, 1], [], []>} : vector<8x32xf32>, vector<32x128xf32>, vector<8x128xf32> -> vector<8x128xf32>
    %c0_36 = arith.constant 0 : index
    %c0_37 = arith.constant 0 : index
    %85 = vector.load %arg11[%c0_36, %c0_37] : memref<1x128xf32, #tpu.memory_space<vmem>>, vector<1x128xf32>
    %86 = vector.broadcast %85 : vector<1x128xf32> to vector<8x128xf32>
    %87 = arith.addf %84, %86 : vector<8x128xf32>
    %cst_38 = arith.constant 5.000000e-01 : f32
    %88 = vector.broadcast %cst_38 : f32 to vector<8x128xf32>
    %89 = arith.mulf %88, %87 : vector<8x128xf32>
    %cst_39 = arith.constant 0.707106769 : f32
    %90 = vector.broadcast %cst_39 : f32 to vector<8x128xf32>
    %91 = arith.mulf %87, %90 : vector<8x128xf32>
    %92 = math.absf %91 : vector<8x128xf32>
    %cst_40 = arith.constant 0.327591091 : f32
    %93 = vector.broadcast %cst_40 : f32 to vector<8x128xf32>
    %94 = arith.mulf %93, %92 : vector<8x128xf32>
    %cst_41 = arith.constant 1.000000e+00 : f32
    %95 = vector.broadcast %cst_41 : f32 to vector<8x128xf32>
    %96 = arith.addf %95, %94 : vector<8x128xf32>
    %cst_42 = arith.constant 1.000000e+00 : f32
    %97 = vector.broadcast %cst_42 : f32 to vector<8x128xf32>
    %98 = arith.divf %97, %96 : vector<8x128xf32>
    %cst_43 = arith.constant 1.06140542 : f32
    %99 = vector.broadcast %cst_43 : f32 to vector<8x128xf32>
    %100 = arith.mulf %99, %98 : vector<8x128xf32>
    %cst_44 = arith.constant 1.45315206 : f32
    %101 = vector.broadcast %cst_44 : f32 to vector<8x128xf32>
    %102 = arith.subf %100, %101 : vector<8x128xf32>
    %103 = arith.mulf %102, %98 : vector<8x128xf32>
    %cst_45 = arith.constant 1.42141378 : f32
    %104 = vector.broadcast %cst_45 : f32 to vector<8x128xf32>
    %105 = arith.addf %103, %104 : vector<8x128xf32>
    %106 = arith.mulf %105, %98 : vector<8x128xf32>
    %cst_46 = arith.constant 0.284496725 : f32
    %107 = vector.broadcast %cst_46 : f32 to vector<8x128xf32>
    %108 = arith.subf %106, %107 : vector<8x128xf32>
    %109 = arith.mulf %108, %98 : vector<8x128xf32>
    %cst_47 = arith.constant 0.254829586 : f32
    %110 = vector.broadcast %cst_47 : f32 to vector<8x128xf32>
    %111 = arith.addf %109, %110 : vector<8x128xf32>
    %112 = arith.mulf %111, %98 : vector<8x128xf32>
    %cst_48 = arith.constant 0.000000e+00 : f32
    %113 = vector.broadcast %cst_48 : f32 to vector<8x128xf32>
    %114 = arith.subf %113, %92 : vector<8x128xf32>
    %115 = arith.mulf %114, %92 : vector<8x128xf32>
    %116 = math.exp %115 : vector<8x128xf32>
    %117 = arith.mulf %112, %116 : vector<8x128xf32>
    %cst_49 = arith.constant 1.000000e+00 : f32
    %118 = vector.broadcast %cst_49 : f32 to vector<8x128xf32>
    %119 = arith.subf %118, %117 : vector<8x128xf32>
    %cst_50 = arith.constant 0.000000e+00 : f32
    %120 = vector.broadcast %cst_50 : f32 to vector<8x128xf32>
    %121 = arith.cmpf olt, %91, %120 : vector<8x128xf32>
    %cst_51 = arith.constant 0.000000e+00 : f32
    %122 = vector.broadcast %cst_51 : f32 to vector<8x128xf32>
    %123 = arith.subf %122, %119 : vector<8x128xf32>
    %124 = arith.select %121, %123, %119 : vector<8x128xi1>, vector<8x128xf32>
    %cst_52 = arith.constant 1.000000e+00 : f32
    %125 = vector.broadcast %cst_52 : f32 to vector<8x128xf32>
    %126 = arith.addf %125, %124 : vector<8x128xf32>
    %127 = arith.mulf %89, %126 : vector<8x128xf32>
    %c0_53 = arith.constant 0 : index
    %c0_54 = arith.constant 0 : index
    %128 = vector.load %arg12[%c0_53, %c0_54] : memref<128x32xf32, #tpu.memory_space<vmem>>, vector<128x32xf32>
    %cst_55 = arith.constant dense<0.000000e+00> : vector<8x32xf32>
    %129 = tpu.matmul %127, %128, %cst_55 {dimension_numbers = #tpu.dot_dimension_numbers<[1], [0], [0], [1], [0, 0, 1, 1], [], []>} : vector<8x128xf32>, vector<128x32xf32>, vector<8x32xf32> -> vector<8x32xf32>
    %c0_56 = arith.constant 0 : index
    %c0_57 = arith.constant 0 : index
    %130 = vector.load %arg13[%c0_56, %c0_57] : memref<1x32xf32, #tpu.memory_space<vmem>>, vector<1x32xf32>
    %131 = vector.broadcast %130 : vector<1x32xf32> to vector<8x32xf32>
    %132 = arith.addf %129, %131 : vector<8x32xf32>
    %133 = arith.addf %60, %132 : vector<8x32xf32>
    %134 = vector.shape_cast %133 : vector<8x32xf32> to vector<1x8x32xf32>
    %c0_58 = arith.constant 0 : index
    %c0_59 = arith.constant 0 : index
    %c0_60 = arith.constant 0 : index
    %135 = vector.load %arg14[%c0_58, %c0_59, %c0_60] : memref<1x8x32xf32, #tpu.memory_space<vmem>>, vector<1x8x32xf32>
    tpu.vector_store %arg14[%c0_58, %c0_59, %c0_60], %134 {strides = array<i32>} : memref<1x8x32xf32, #tpu.memory_space<vmem>>, vector<1x8x32xf32>,
    return
  }
  func.func @transform_0(%arg0: i32) -> (i32, i32, i32) {
    %c0_i32 = arith.constant 0 : i32
    %c0_i32_0 = arith.constant 0 : i32
    %c0_i32_1 = arith.constant 0 : i32
    return %arg0, %c0_i32, %c0_i32_0 : i32, i32, i32
  }
  func.func @transform_1(%arg0: i32) -> (i32, i32) {
    %c0_i32 = arith.constant 0 : i32
    %c0_i32_0 = arith.constant 0 : i32
    %c0_i32_1 = arith.constant 0 : i32
    return %c0_i32, %c0_i32_0 : i32, i32
  }
  func.func @transform_2(%arg0: i32) -> (i32, i32) {
    %c0_i32 = arith.constant 0 : i32
    %c0_i32_0 = arith.constant 0 : i32
    %c0_i32_1 = arith.constant 0 : i32
    return %c0_i32, %c0_i32_0 : i32, i32
  }
  func.func @transform_3(%arg0: i32) -> (i32, i32) {
    %c0_i32 = arith.constant 0 : i32
    %c0_i32_0 = arith.constant 0 : i32
    %c0_i32_1 = arith.constant 0 : i32
    return %c0_i32, %c0_i32_0 : i32, i32
  }
  func.func @transform_4(%arg0: i32) -> (i32, i32) {
    %c0_i32 = arith.constant 0 : i32
    %c0_i32_0 = arith.constant 0 : i32
    %c0_i32_1 = arith.constant 0 : i32
    return %c0_i32, %c0_i32_0 : i32, i32
  }
  func.func @transform_5(%arg0: i32) -> (i32, i32) {
    %c0_i32 = arith.constant 0 : i32
    %c0_i32_0 = arith.constant 0 : i32
    %c0_i32_1 = arith.constant 0 : i32
    return %c0_i32, %c0_i32_0 : i32, i32
  }
  func.func @transform_6(%arg0: i32) -> (i32, i32) {
    %c0_i32 = arith.constant 0 : i32
    %c0_i32_0 = arith.constant 0 : i32
    %c0_i32_1 = arith.constant 0 : i32
    return %c0_i32, %c0_i32_0 : i32, i32
  }
  func.func @transform_7(%arg0: i32) -> (i32, i32) {
    %c0_i32 = arith.constant 0 : i32
    %c0_i32_0 = arith.constant 0 : i32
    %c0_i32_1 = arith.constant 0 : i32
    return %c0_i32, %c0_i32_0 : i32, i32
  }
  func.func @transform_8(%arg0: i32) -> (i32, i32) {
    %c0_i32 = arith.constant 0 : i32
    %c0_i32_0 = arith.constant 0 : i32
    %c0_i32_1 = arith.constant 0 : i32
    return %c0_i32, %c0_i32_0 : i32, i32
  }
  func.func @transform_9(%arg0: i32) -> (i32, i32) {
    %c0_i32 = arith.constant 0 : i32
    %c0_i32_0 = arith.constant 0 : i32
    %c0_i32_1 = arith.constant 0 : i32
    return %c0_i32, %c0_i32_0 : i32, i32
  }
  func.func @transform_10(%arg0: i32) -> (i32, i32) {
    %c0_i32 = arith.constant 0 : i32
    %c0_i32_0 = arith.constant 0 : i32
    %c0_i32_1 = arith.constant 0 : i32
    return %c0_i32, %c0_i32_0 : i32, i32
  }
  func.func @transform_11(%arg0: i32) -> (i32, i32) {
    %c0_i32 = arith.constant 0 : i32
    %c0_i32_0 = arith.constant 0 : i32
    %c0_i32_1 = arith.constant 0 : i32
    return %c0_i32, %c0_i32_0 : i32, i32
  }
  func.func @transform_12(%arg0: i32) -> (i32, i32) {
    %c0_i32 = arith.constant 0 : i32
    %c0_i32_0 = arith.constant 0 : i32
    %c0_i32_1 = arith.constant 0 : i32
    return %c0_i32, %c0_i32_0 : i32, i32
  }
  func.func @transform_13(%arg0: i32) -> (i32, i32, i32) {
    %c0_i32 = arith.constant 0 : i32
    %c0_i32_0 = arith.constant 0 : i32
    %c0_i32_1 = arith.constant 0 : i32
    return %arg0, %c0_i32, %c0_i32_0 : i32, i32, i32
  }
}

</mosaic_0001>

<bundles_post_ra>
// kernel: tpu_custom_call.1
= control target key start
LH: loop header
LB: loop body
LE: loop exit
PB: predicated region body
PF: predicated region fallthrough
CT: control target
= control target key end

     0   :  { %s3050_s0 = inlined_call_operand.vmem [shape: f32[2,8,32], index: 0, kind: input, shape index: {}]   ;;  %s3051_s1 = inlined_call_operand.vmem [shape: f32[1,32], index: 1, kind: input, shape index: {}]   ;;  %s3052_s2 = inlined_call_operand.vmem [shape: f32[1,32], index: 2, kind: input, shape index: {}]   ;;  %s3053_s3 = inlined_call_operand.vmem [shape: f32[32,96], index: 3, kind: input, shape index: {}]   ;;  %s3054_s4 = inlined_call_operand.vmem [shape: f32[1,96], index: 4, kind: input, shape index: {}]   ;;  %s3055_s5 = inlined_call_operand.vmem [shape: f32[32,32], index: 5, kind: input, shape index: {}]   ;;  %s3056_s6 = inlined_call_operand.vmem [shape: f32[1,32], index: 6, kind: input, shape index: {}]   ;;  %s3057_s7 = inlined_call_operand.vmem [shape: f32[1,32], index: 7, kind: input, shape index: {}]   ;;  %s3058_s8 = inlined_call_operand.vmem [shape: f32[1,32], index: 8, kind: input, shape index: {}]   ;;  %s3059_s9 = inlined_call_operand.vmem [shape: f32[32,128], index: 9, kind: input, shape index: {}]   ;;  %s3060_s10 = inlined_call_operand.vmem [shape: f32[1,128], index: 10, kind: input, shape index: {}]   ;;  %s3061_s11 = inlined_call_operand.vmem [shape: f32[128,32], index: 11, kind: input, shape index: {}]   ;;  %s3062_s12 = inlined_call_operand.vmem [shape: f32[1,32], index: 12, kind: input, shape index: {}]   ;;  %s3063_s13 = inlined_call_operand.hbm [shape: f32[2,8,32], index: 13, kind: output, shape index: {}]  }
   0x1   :  { %3064 = sst [smem:[#allocation5_spill]] %s3050_s0 }
   0x2   :  { %3065 = sst [smem:[#allocation6_spill]] %s3051_s1 }
   0x3   :  { %3066 = sst [smem:[#allocation7_spill]] %s3052_s2 }
   0x4   :  { %18 = vsyncpa [#allocation3], 0 }
   0x5   :  { %20 = vsyncpa [#allocation3 + $0x1], 0  ;;  %s2646_s25 = smov 0   ;;  %s2648_s26 = smov 0  }
   0x6   :  { %s2650_s27 = smov 0   ;;  %s2652_s28 = smov 0  }
   0x7 LB: > { %s2667_s29 = sadd.s32 4294967295, %s2560_s28   ;;  %s2181_s30 = sadd.s32 4294967294, %s2560_s28   ;;  %s2560_s28 = sphi %s2652_s28, %s3075_s28   ;;  %s2556_s27 = sphi %s2650_s27, %s3074_s27   ;;  %s2552_s26 = sphi %s2648_s26, %s3073_s26   ;;  %s2548_s25 = sphi %s2646_s25, %s3072_s25  }
   0x8   : > { %s2671_s14 = sadd.s32 1, %s2560_s28   ;;  %s311_s15 = sadd.s32 1, %s2556_s27 }
   0x9   : > { %s308_s16 = ssub.s32 %s2560_s28, %s2671_s14  ;;  %p321_p0 = scmp.ne.s32.totalorder %s2556_s27, %s2552_s26 }
   0xa   : > { %p309_p1 = scmp.eq.s32.totalorder %s308_s16, 0  ;;  %p322_p2 = scmp.eq.s32.totalorder %s2667_s29, 1 }
   0xb   : > { %p327_p3 = scmp.ne.s32.totalorder %s2552_s26, %s2548_s25  ;;  %p328_p4 = scmp.eq.s32.totalorder %s2181_s30, 1 }
   0xc   : > { %s2682_s17 = scalar_select %p309_p1, %s2556_s27, %s311_s15  }
   0xd   : > { %p2684_p5 = por %p322_p2, %p321_p0  ;;  %p2688_p6 = por %p328_p4, %p327_p3 }
   0xe   : > { %p2184_p7 = scmp.ge.s32.totalorder %s2560_s28, 1  ;;  %p389_p8 = scmp.lt.s32.totalorder %s2560_s28, 3 }
  0x10   : > { %p390_p9 = pnand %p2184_p7, %p389_p8 }
  0x11   : > { %p432_p10 = scmp.lt.s32.totalorder (!%p390_p9), %s2667_s29, 1  ;;  %vm439_vm0 = vcmask (!%p390_p9), 261120   ;;  %s3069_s0 = sld [smem:[#allocation5_spill]] (!%p390_p9)  ;;  %v468_v7 = vld [vmem:[%s3053_s3] sm:$0xff] (!%p390_p9)  ;;  %v469_v8 = vld [vmem:[%s3053_s3 + $0x8] sm:$0xff] (!%p390_p9)  ;;  %v470_v9 = vld [vmem:[%s3053_s3 + $0x10] sm:$0xff] (!%p390_p9)  ;;  %v567_v33 = vlaneseq (!%p390_p9) }
  0x12   : > { %393 = sbr.rel (%p390_p9) target bundleno = 2736 (0xab0), region = 72  ;;  %v2562_v10 = vmov (!%p390_p9), 0.0|0.0   ;;  %v2381_v11 = vpack.c.bf16 (!%p390_p9), %v469_v8, %v468_v7  ;;  %v471_v12 = vld [vmem:[%s3053_s3 + $0x18] sm:$0xff] (!%p390_p9)  ;;  %vm2563_vm1 = vmmov (!%p390_p9), 0   ;;  %v2564_v13 = vmov (!%p390_p9), 0.0   ;;  %s3070_s1 = sld [smem:[#allocation6_spill]] (!%p390_p9) }
  0x13   : > { %2380 = vmatprep.subr.bf16.mxu1 (!%p390_p9), %v2562_v10  ;;  %2280 = vmatprep.mubr.msk.f32.mxu1 (!%p390_p9), %vm2563_vm1, %v2564_v13  ;;  %v2384_v14 = vpack.c.bf16 (!%p390_p9), %v471_v12, %v470_v9  ;;  %s3071_s2 = sld [smem:[#allocation7_spill]] (!%p390_p9)  ;;  %v2189_v24 = vld [vmem:[%s3054_s4] ss:$0 sm:$0xff] (!%p390_p9)  ;;  %s2565_s23 = smov (!%p390_p9), 104   ;;  %v2569_v31 = vmov (!%p390_p9), 1983009808  }
  0x14   : > { %2293 = vmatprep.subr.mxu0 (!%p390_p9), %v2564_v13  ;;  %2295 = vmatprep.mubr.msk.f32.mxu0 (!%p390_p9), %vm2563_vm1, %v2564_v13  ;;  %s2567_s30 = smov (!%p390_p9), 112   ;;  %s2568_s15 = smov (!%p390_p9), 96   ;;  %v565_v32 = vunpack.c.l.s4 (!%p390_p9), %v2569_v31  ;;  %v568_v35 = vshrl.u32 (!%p390_p9), %v567_v33, 7  ;;  %v2570_v36 = vmov (!%p390_p9), 1934713408   ;;  %vm994_vm2 = vcmask (!%p390_p9), 64512  }
  0x15   : > { %2382 = vmatpush3.bf16.msra.mxu1 (!%p390_p9), %v2381_v11  ;;  %v597_v37 = vunpack.c.l.s4 (!%p390_p9), %v2570_v36  ;;  %s2571_s16 = smov (!%p390_p9), 64   ;;  %s2574_s22 = smov (!%p390_p9), 24   ;;  %vm1784_vm3 = vcmask (!%p390_p9), 130048   ;;  %vm1786_vm4 = vcmask (!%p390_p9), 195584  }
  0x16   : > { %2383 = vmatprep.subr.bf16.mxu1 (!%p390_p9), %v2562_v10  ;;  %v566_v34 = vunpack.c.0.s8 (!%p390_p9), %v565_v32 }
  0x17   : > { %v598_v44 = vunpack.c.0.s8 (!%p390_p9), %v597_v37 }
  0x18   : > { %v2187_v19 = vld [vmem:[%s3070_s1] ss:$0 sm:$0xff] (!%p390_p9)  ;;  %v2756_v41 = vsub.s32 (!%p390_p9), %v566_v34, %v568_v35 }
  0x19   : > { %s433_s20 = scalar_select %p432_p10, %s2667_s29, 1  ;;  %2385 = vmatpush3.bf16.msra.mxu1 %v2384_v14  ;;  %v2188_v21 = vld [vmem:[%s3071_s2] ss:$0 sm:$0xff]  ;;  %v2766_v50 = vsub.s32 %v598_v44, %v568_v35 }
  0x1a   : > { %2283 = vmatprep.subr.mxu1 %v2564_v13 }
  0x1b   : > { %s2186_s21 = sshll.u32 %s433_s20, 3  ;;  %s2572_s20 = smov 16  }
  0x1c   : > { %s435_s24 = scalar_lea.vmem %s3069_s0, %s2186_s21  ;;  %s2573_s21 = smov 8  }
  0x1d   : > { %v2699_v0 = vld [vmem:[%s435_s24] sm:$0xff]  ;;  %s2566_s24 = smov 120  }
  0x1e   : > { %v440_v1 = vsel %vm439_vm0, %v2699_v0, 0.0 }
  0x1f   : > { %441 = vadd.xlane.f32.xlu0 %v440_v1 }
  0xac   : > { %v442_v2 = vpop.xlane.xlu0 %441 }
  0xad   : > { %v444_v3 = vmul.f32 0.03125, %v442_v2 }
  0xaf   : > { %v445_v4 = vsub.f32 %v2699_v0, %v444_v3 }
  0xb1   : > { %v446_v5 = vmul.f32 %v445_v4, %v445_v4 }
  0xb3   : > { %v447_v6 = vsel %vm439_vm0, %v446_v5, 0.0 }
  0xb4   : > { %448 = vadd.xlane.f32.xlu0 %v447_v6 }
 0x141   : > { %v449_v15 = vpop.xlane.xlu0 %448 }
 0x142   : > { %v450_v16 = vmul.f32 0.03125, %v449_v15 }
 0x144   : > { %v451_v17 = vadd.f32 1e-05, %v450_v16 }
 0x146   : > { %2474 = vrsqrt.f32 %v451_v17 }
 0x150   : > { %v2475_v18 = vpop.eup %2474 }
 0x151   : > { %v453_v20 = vmul.f32 %v2475_v18, %v445_v4 }
 0x153   : > { %v460_v22 = vmul.f32 %v2187_v19, %v453_v20 }
 0x155   : > { %v467_v23 = vadd.f32 %v2188_v21, %v460_v22 }
 0x157   : > { %2281 = vmatmul.mubr.msk.f32.vlgmr.msra.gmra.mrb[0].mxu1 %vm439_vm0, %v467_v23 }
 0x158   : > { %2285 = vmatprep.mubr.msk.f32.mxu1 %vm2563_vm1, %v2564_v13 }
 0x22a   : > { %v548_v25 = vpop.f32.mrb[0].mxu1 }
 0x22b   : > { %v2737_v26 = vadd.f32 %v2189_v24, %v548_v25  ;;  %v2282_v27 = vpop.f32.mrb[1].mxu1 }
 0x22d   : > { %559 = vrot.lane.b32.xlu0 %v2737_v26, %s2565_s23  ;;  %553 = vrot.lane.b32.xlu1 %v2737_v26, %s2566_s24  ;;  %s429_s23 = sand.u32 1, %s2552_s26  }
 0x22e   : > { %s2185_s24 = sshll.u32 %s429_s23, 3 }
 0x231   : > { %556 = vrot.lane.b32.xlu1 %v2737_v26, %s2567_s30  ;;  %s2109_s30 = scalar_lea.sflag [#allocation3], %s429_s23 }
 0x235   : > { %698 = vrot.lane.b32.xlu1 %v2737_v26, %s2568_s15 }
 0x29f   : > { %v2743_v28 = vpop.permute.xlu1 %553  ;;  %v2749_v30 = vpop.permute.xlu0 %559 }
 0x2a0   : > { %700 = vrot.lane.b32.xlu1 %v2743_v28, %s2568_s15  ;;  %v578_v42 = vcombine.low %v2743_v28, %v2749_v30  ;;  %v579_v43 = vcombine.high %v2743_v28, %v2749_v30 }
 0x2a2   : > { %v586_v48 = vrot.slane %v578_v42, %v2756_v41  ;;  %v593_v49 = vrot.slane %v579_v43, %v2756_v41 }
 0x2a3   : > { %v2746_v29 = vpop.permute.xlu1 %556 }
 0x2a4   : > { %702 = vrot.lane.b32.xlu1 %v2746_v29, %s2568_s15  ;;  %v562_v38 = vcombine.low %v2737_v26, %v2746_v29  ;;  %v563_v39 = vcombine.high %v2737_v26, %v2746_v29 }
 0x2a6   : > { %v570_v45 = vrot.slane %v562_v38, %v2756_v41  ;;  %v577_v46 = vrot.slane %v563_v39, %v2756_v41 }
 0x2a7   : > { %v699_v40 = vpop.permute.xlu1 %698 }
 0x2a8   : > { %704 = vrot.lane.b32.xlu1 %v2749_v30, %s2568_s15  ;;  %v594_v51 = vcombine.low %v570_v45, %v586_v48  ;;  %v595_v52 = vcombine.high %v570_v45, %v586_v48  ;;  %v610_v53 = vcombine.low %v577_v46, %v593_v49  ;;  %v611_v54 = vcombine.high %v577_v46, %v593_v49 }
 0x2aa   : > { %v602_v58 = vrot.slane %v594_v51, %v2766_v50  ;;  %v609_v59 = vrot.slane %v595_v52, %v2766_v50  ;;  %v618_v60 = vrot.slane %v610_v53, %v2766_v50  ;;  %v625_v61 = vrot.slane %v611_v54, %v2766_v50 }
 0x2ac   : > { %v630_v6 = vcombine.low %v602_v58, %v609_v59  ;;  %v2191_v7 = vcombine.high %v602_v58, %v609_v59  ;;  %v646_v8 = vcombine.low %v618_v60, %v625_v61  ;;  %v2192_v9 = vcombine.high %v618_v60, %v625_v61 }
 0x2ae   : > { %v637_v20 = vrot.slane %v630_v6, %v2756_v41  ;;  %v645_v21 = vrot.slane %v2191_v7, %v2756_v41  ;;  %v653_v22 = vrot.slane %v646_v8, %v2756_v41  ;;  %v661_v23 = vrot.slane %v2192_v9, %v2756_v41 }
 0x2b0   : > { %v662_v36 = vcombine.low %v637_v20, %v645_v21  ;;  %v678_v37 = vcombine.low %v653_v22, %v661_v23  ;;  %v663_v38 = vcombine.high %v637_v20, %v645_v21  ;;  %v679_v39 = vcombine.high %v653_v22, %v661_v23 }
 0x2b2   : > { %v670_v49 = vrot.slane %v662_v36, %v2766_v50  ;;  %v686_v51 = vrot.slane %v678_v37, %v2766_v50  ;;  %v677_v52 = vrot.slane %v663_v38, %v2766_v50  ;;  %v693_v53 = vrot.slane %v679_v39, %v2766_v50 }
 0x2b4   : > { %v695_v59 = vcombine.high %v670_v49, %v686_v51  ;;  %v697_v61 = vcombine.high %v677_v52, %v693_v53 }
 0x312   : > { %v701_v47 = vpop.permute.xlu1 %700 }
 0x316   : > { %v703_v55 = vpop.permute.xlu1 %702 }
 0x317   : > { %v710_v56 = vcombine.low %v699_v40, %v703_v55  ;;  %v711_v57 = vcombine.high %v699_v40, %v703_v55 }
 0x319   : > { %v718_v2 = vrot.slane %v710_v56, %v2756_v41  ;;  %v725_v3 = vrot.slane %v711_v57, %v2756_v41  ;;  %v694_v56 = vcombine.low %v670_v49, %v686_v51  ;;  %v696_v57 = vcombine.low %v677_v52, %v693_v53 }
 0x31a   : > { %v705_v62 = vpop.permute.xlu1 %704 }
 0x31b   : > { %v726_v63 = vcombine.low %v701_v47, %v705_v62  ;;  %v727_v1 = vcombine.high %v701_v47, %v705_v62 }
 0x31d   : > { %v734_v4 = vrot.slane %v726_v63, %v2756_v41  ;;  %v741_v5 = vrot.slane %v727_v1, %v2756_v41 }
 0x31f   : > { %v742_v11 = vcombine.low %v718_v2, %v734_v4  ;;  %v743_v12 = vcombine.high %v718_v2, %v734_v4  ;;  %v758_v14 = vcombine.low %v725_v3, %v741_v5  ;;  %v759_v15 = vcombine.high %v725_v3, %v741_v5 }
 0x321   : > { %v750_v16 = vrot.slane %v742_v11, %v2766_v50  ;;  %v757_v17 = vrot.slane %v743_v12, %v2766_v50  ;;  %v766_v18 = vrot.slane %v758_v14, %v2766_v50  ;;  %v773_v19 = vrot.slane %v759_v15, %v2766_v50 }
 0x323   : > { %v778_v24 = vcombine.low %v750_v16, %v757_v17  ;;  %v2193_v25 = vcombine.high %v750_v16, %v757_v17  ;;  %v794_v27 = vcombine.low %v766_v18, %v773_v19  ;;  %v2194_v31 = vcombine.high %v766_v18, %v773_v19 }
 0x325   : > { %v785_v32 = vrot.slane %v778_v24, %v2756_v41  ;;  %v793_v33 = vrot.slane %v2193_v25, %v2756_v41  ;;  %v801_v34 = vrot.slane %v794_v27, %v2756_v41  ;;  %v809_v35 = vrot.slane %v2194_v31, %v2756_v41 }
 0x327   : > { %v810_v40 = vcombine.low %v785_v32, %v793_v33  ;;  %v826_v42 = vcombine.low %v801_v34, %v809_v35  ;;  %v811_v43 = vcombine.high %v785_v32, %v793_v33  ;;  %v827_v44 = vcombine.high %v801_v34, %v809_v35 }
 0x329   : > { %v818_v45 = vrot.slane %v810_v40, %v2766_v50  ;;  %v834_v46 = vrot.slane %v826_v42, %v2766_v50  ;;  %v825_v47 = vrot.slane %v811_v43, %v2766_v50  ;;  %v841_v48 = vrot.slane %v827_v44, %v2766_v50 }
 0x32b   : > { %v842_v54 = vcombine.low %v818_v45, %v834_v46  ;;  %v844_v55 = vcombine.low %v825_v47, %v841_v48  ;;  %v843_v58 = vcombine.high %v818_v45, %v834_v46  ;;  %v845_v60 = vcombine.high %v825_v47, %v841_v48 }
 0x32d   : > { %2284 = vmatpush3.xpose.msk.msra.mxu1 %vm994_vm2, %v842_v54  ;;  %2294 = vmatpush3.xpose.msk.msra.mxu0 %vm994_vm2, %v844_v55 }
 0x32e   : > { %2288 = vmatprep.subr.mxu1 %v2564_v13  ;;  %2303 = vmatprep.subr.mxu0 %v2564_v13 }
 0x330   : > { %2286 = vmatmul.mubr.msk.f32.vlgmr.msra.gmra.mrb[2].mxu1 %vm994_vm2, %v694_v56  ;;  %2296 = vmatmul.mubr.msk.f32.vlgmr.msra.gmra.mrb[0].mxu0 %vm994_vm2, %v696_v57 }
 0x331   : > { %2289 = vmatpush3.xpose.msk.msra.mxu1 %vm994_vm2, %v843_v58  ;;  %2290 = vmatprep.mubr.msk.f32.mxu1 %vm2563_vm1, %v2564_v13 }
 0x332   : > { %2298 = vmatprep.subr.mxu1 %v2564_v13  ;;  %2305 = vmatprep.mubr.msk.f32.mxu0 %vm2563_vm1, %v2564_v13 }
 0x334   : > { %2291 = vmatmul.mubr.msk.f32.vlgmr.msra.gmra.mrb[4].mxu1 %vm994_vm2, %v695_v59 }
 0x335   : > { %2299 = vmatpush3.xpose.msk.msra.mxu1 %vm994_vm2, %v845_v60  ;;  %2300 = vmatprep.mubr.msk.f32.mxu1 %vm2563_vm1, %v2564_v13 }
 0x336   : > { %2308 = vmatprep.subr.mxu1 %v2564_v13 }
 0x338   : > { %2301 = vmatmul.mubr.msk.f32.vlgmr.msra.gmra.mrb[6].mxu1 %vm994_vm2, %v697_v61 }
 0x339   : > { %2310 = vmatprep.mubr.msk.f32.mxu1 %vm2563_vm1, %v2564_v13 }
 0x403   : > { %v1067_v62 = vpop.f32.mrb[2].mxu1  ;;  %v1219_v63 = vpop.f32.mrb[0].mxu0 }
 0x404   : > { %v2287_v1 = vpop.f32.mrb[3].mxu1  ;;  %v2297_v2 = vpop.f32.mrb[1].mxu0  ;;  %v1299_v3 = vsel %vm994_vm2, %v1067_v62, -inf  ;;  %v1305_v6 = vsel %vm994_vm2, %v1219_v63, -inf }
 0x405   : > { %1300 = vmax.xlane.f32.xlu1 %v1299_v3 }
 0x407   : > { %v1143_v4 = vpop.f32.mrb[4].mxu1 }
 0x408   : > { %v2292_v5 = vpop.f32.mrb[5].mxu1  ;;  %v1302_v7 = vsel %vm994_vm2, %v1143_v4, -inf }
 0x409   : > { %1306 = vmax.xlane.f32.xlu1 %v1305_v6  ;;  %1303 = vmax.xlane.f32.xlu0 %v1302_v7 }
 0x40b   : > { %v1295_v8 = vpop.f32.mrb[6].mxu1 }
 0x40c   : > { %v2302_v9 = vpop.f32.mrb[7].mxu1  ;;  %v1308_v11 = vsel %vm994_vm2, %v1295_v8, -inf }
 0x40d   : > { %1309 = vmax.xlane.f32.xlu0 %v1308_v11 }
 0x41a   : > { %846 = vrot.lane.b32.xlu1 %v2737_v26, %s2571_s16 }
 0x492   : > { %v1301_v12 = vpop.xlane.xlu1 %1300 }
 0x493   : > { %v1311_v14 = vsub.f32 %v1067_v62, %v1301_v12 }
 0x495   : > { %v1315_v15 = vmul.f32 1.442695, %v1311_v14 }
 0x496   : > { %v1307_v16 = vpop.xlane.xlu1 %1306  ;;  %v1304_v17 = vpop.xlane.xlu0 %1303 }
 0x497   : > { %2476 = vpow2.f32 %v1315_v15  ;;  %v1313_v18 = vsub.f32 %v1219_v63, %v1307_v16  ;;  %v1312_v19 = vsub.f32 %v1143_v4, %v1304_v17 }
 0x499   : > { %v1319_v20 = vmul.f32 1.442695, %v1313_v18  ;;  %v1317_v21 = vmul.f32 1.442695, %v1312_v19 }
 0x49a   : > { %v1310_v22 = vpop.xlane.xlu0 %1309  ;;  %v847_v36 = vpop.permute.xlu1 %846 }
 0x49b   : > { %2478 = vpow2.f32 %v1319_v20  ;;  %v1314_v23 = vsub.f32 %v1295_v8, %v1310_v22 }
 0x49c   : > { %2480 = vpow2.f32 %v1317_v21 }
 0x49d   : > { %v1321_v24 = vmul.f32 1.442695, %v1314_v23 }
 0x49f   : > { %2482 = vpow2.f32 %v1321_v24 }
 0x4a1   : > { %v2822_v25 = vpop.eup %2476 }
 0x4a2   : > { %v1323_v26 = vsel %vm994_vm2, %v2822_v25, 0.0 }
 0x4a3   : > { %1324 = vadd.xlane.f32.xlu1 %v1323_v26 }
 0x4a5   : > { %v2826_v27 = vpop.eup %2478 }
 0x4a6   : > { %v2481_v31 = vpop.eup %2480  ;;  %v1329_v32 = vsel %vm994_vm2, %v2826_v27, 0.0 }
 0x4a7   : > { %1330 = vadd.xlane.f32.xlu1 %v1329_v32  ;;  %v1326_v33 = vsel %vm994_vm2, %v2481_v31, 0.0 }
 0x4a8   : > { %1327 = vadd.xlane.f32.xlu0 %v1326_v33 }
 0x4a9   : > { %v2831_v34 = vpop.eup %2482 }
 0x4aa   : > { %v1332_v35 = vsel %vm994_vm2, %v2831_v34, 0.0 }
 0x4ac   : > { %1333 = vadd.xlane.f32.xlu0 %v1332_v35 }
 0x4b8   : > { %850 = vrot.lane.b32.xlu1 %v2746_v29, %s2571_s16 }
 0x4bc   : > { %852 = vrot.lane.b32.xlu1 %v2749_v30, %s2571_s16 }
 0x4c2   : > { %848 = vrot.lane.b32.xlu0 %v2743_v28, %s2571_s16  ;;  %s2221_s16 = sshll.u32 %s2667_s29, 7 }
 0x4c3   : > { %s3007_s1 = scalar_lea.hbm %s3063_s13, %s2221_s16 }
 0x530   : > { %v1325_v37 = vpop.xlane.xlu1 %1324 }
 0x531   : > { %2484 = vrcp.f32 %v1325_v37 }
 0x534   : > { %v1331_v38 = vpop.xlane.xlu1 %1330 }
 0x535   : > { %v1328_v39 = vpop.xlane.xlu0 %1327 }
 0x536   : > { %2486 = vrcp.f32 %v1328_v39 }
 0x537   : > { %2488 = vrcp.f32 %v1331_v38 }
 0x538   : > { %v851_v40 = vpop.permute.xlu1 %850 }
 0x539   : > { %v1334_v42 = vpop.xlane.xlu0 %1333  ;;  %v858_v43 = vcombine.low %v847_v36, %v851_v40  ;;  %v859_v44 = vcombine.high %v847_v36, %v851_v40 }
 0x53a   : > { %2490 = vrcp.f32 %v1334_v42 }
 0x53b   : > { %v866_v29 = vrot.slane %v858_v43, %v2756_v41  ;;  %v873_v30 = vrot.slane %v859_v44, %v2756_v41  ;;  %v2485_v4 = vpop.eup %2484 }
 0x53c   : > { %v853_v45 = vpop.permute.xlu1 %852  ;;  %v1336_v20 = vmul.f32 %v2485_v4, %v2822_v25  ;;  %v1788_v25 = vld [vmem:[%s3055_s5] sm:$0xff] }
 0x53d   : > { %v849_v46 = vpop.permute.xlu0 %848 }
 0x53e   : > { %v874_v47 = vcombine.low %v849_v46, %v853_v45  ;;  %v875_v48 = vcombine.high %v849_v46, %v853_v45 }
 0x540   : > { %v882_v49 = vrot.slane %v874_v47, %v2756_v41  ;;  %v889_v28 = vrot.slane %v875_v48, %v2756_v41  ;;  %v2487_v9 = vpop.eup %2486 }
 0x541   : > { %v2489_v14 = vpop.eup %2488  ;;  %v1338_v21 = vmul.f32 %v2487_v9, %v2481_v31 }
 0x542   : > { %v890_v51 = vcombine.low %v866_v29, %v882_v49  ;;  %v891_v52 = vcombine.high %v866_v29, %v882_v49  ;;  %v906_v53 = vcombine.low %v873_v30, %v889_v28  ;;  %v907_v54 = vcombine.high %v873_v30, %v889_v28 }
 0x543   : > { %v1340_v24 = vmul.f32 %v2489_v14, %v2826_v27  ;;  %v1789_v27 = vld [vmem:[%s3055_s5 + $0x8] sm:$0xff] }
 0x544   : > { %v898_v55 = vrot.slane %v890_v51, %v2766_v50  ;;  %v905_v56 = vrot.slane %v891_v52, %v2766_v50  ;;  %v914_v57 = vrot.slane %v906_v53, %v2766_v50  ;;  %v921_v58 = vrot.slane %v907_v54, %v2766_v50  ;;  %v2491_v19 = vpop.eup %2490  ;;  %v1790_v51 = vld [vmem:[%s3055_s5 + $0x10] sm:$0xff]  ;;  %v1791_v52 = vld [vmem:[%s3055_s5 + $0x18] sm:$0xff] }
 0x545   : > { %v1342_v26 = vmul.f32 %v2491_v19, %v2831_v34  ;;  %v2387_v31 = vpack.c.bf16 %v1789_v27, %v1788_v25 }
 0x546   : > { %v926_v59 = vcombine.low %v898_v55, %v905_v56  ;;  %v2195_v60 = vcombine.high %v898_v55, %v905_v56  ;;  %v942_v61 = vcombine.low %v914_v57, %v921_v58  ;;  %v2196_v62 = vcombine.high %v914_v57, %v921_v58 }
 0x547   : > { %v2390_v57 = vpack.c.bf16 %v1791_v52, %v1790_v51  ;;  %v2016_v51 = vld [vmem:[%s3061_s11 + $0x18] sm:$0xff] }
 0x548   : > { %v933_v63 = vrot.slane %v926_v59, %v2756_v41  ;;  %v941_v1 = vrot.slane %v2195_v60, %v2756_v41  ;;  %v949_v2 = vrot.slane %v942_v61, %v2756_v41  ;;  %v957_v3 = vrot.slane %v2196_v62, %v2756_v41 }
 0x54a   : > { %v958_v5 = vcombine.low %v933_v63, %v941_v1  ;;  %v974_v6 = vcombine.low %v949_v2, %v957_v3  ;;  %v959_v7 = vcombine.high %v933_v63, %v941_v1  ;;  %v975_v8 = vcombine.high %v949_v2, %v957_v3 }
 0x54c   : > { %v966_v11 = vrot.slane %v958_v5, %v2766_v50  ;;  %v982_v12 = vrot.slane %v974_v6, %v2766_v50  ;;  %v973_v15 = vrot.slane %v959_v7, %v2766_v50  ;;  %v989_v16 = vrot.slane %v975_v8, %v2766_v50 }
 0x54e   : > { %v990_v17 = vcombine.low %v966_v11, %v982_v12  ;;  %v991_v18 = vcombine.high %v966_v11, %v982_v12  ;;  %v992_v22 = vcombine.low %v973_v15, %v989_v16  ;;  %v993_v23 = vcombine.high %v973_v15, %v989_v16 }
 0x550   : > { %2304 = vmatpush3.msra.mxu0 %v990_v17  ;;  %2309 = vmatpush3.msra.mxu1 %v991_v18 }
 0x551   : > { %2306 = vmatmul.mubr.msk.f32.vlgmr.msra.gmra.mrb[2].mxu0 %vm994_vm2, %v1336_v20  ;;  %2311 = vmatmul.mubr.msk.f32.vlgmr.msra.gmra.mrb[8].mxu1 %vm994_vm2, %v1338_v21 }
 0x552   : > { %2313 = vmatprep.subr.mxu0 %v2564_v13  ;;  %2318 = vmatprep.subr.mxu1 %v2564_v13 }
 0x553   : > { %2314 = vmatpush3.msra.mxu0 %v992_v22  ;;  %2319 = vmatpush3.msra.mxu1 %v993_v23 }
 0x554   : > { %2315 = vmatprep.mubr.msk.f32.mxu0 %vm2563_vm1, %v2564_v13  ;;  %2320 = vmatprep.mubr.msk.f32.mxu1 %vm2563_vm1, %v2564_v13 }
 0x555   : > { %2316 = vmatmul.mubr.msk.f32.vlgmr.msra.gmra.mrb[4].mxu0 %vm994_vm2, %v1340_v24  ;;  %2321 = vmatmul.mubr.msk.f32.vlgmr.msra.gmra.mrb[10].mxu1 %vm994_vm2, %v1342_v26 }
 0x556   : > { %2386 = vmatprep.subr.bf16.mxu1 %v2562_v10  ;;  %2331 = vmatprep.mubr.msk.f32.mxu1 %vm2563_vm1, %v2564_v13 }
 0x557   : > { %2398 = vmatprep.subr.bf16.mxu0 %v2562_v10  ;;  %2377 = vmatprep.mubr.msk.f32.mxu0 %vm2563_vm1, %v2564_v13 }
 0x558   : > { %2388 = vmatpush3.bf16.msra.mxu1 %v2387_v31 }
 0x559   : > { %2389 = vmatprep.subr.bf16.mxu1 %v2562_v10 }
 0x55c   : > { %2391 = vmatpush3.bf16.msra.mxu1 %v2390_v57  ;;  %v2020_v57 = vld [vmem:[%s3061_s11 + $0x38] sm:$0xff] }
 0x55d   : > { %2392 = vmatprep.subr.bf16.mxu1 %v2562_v10 }
 0x624   : > { %v1412_v32 = vpop.f32.mrb[2].mxu0  ;;  %v1485_v33 = vpop.f32.mrb[8].mxu1 }
 0x625   : > { %v2307_v34 = vpop.f32.mrb[3].mxu0  ;;  %v2312_v35 = vpop.f32.mrb[9].mxu1 }
 0x626   : > { %v1902_v34 = vld [vmem:[%s3059_s9] sm:$0xff] }
 0x628   : > { %v1558_v36 = vpop.f32.mrb[4].mxu0  ;;  %v1631_v37 = vpop.f32.mrb[10].mxu1 }
 0x629   : > { %v1635_v38 = vcombine.low %v1412_v32, %v1558_v36  ;;  %v1636_v39 = vcombine.high %v1412_v32, %v1558_v36  ;;  %v1651_v40 = vcombine.low %v1485_v33, %v1631_v37  ;;  %v1652_v42 = vcombine.high %v1485_v33, %v1631_v37  ;;  %v2317_v43 = vpop.f32.mrb[5].mxu0  ;;  %v2322_v44 = vpop.f32.mrb[11].mxu1  ;;  %v1904_v36 = vld [vmem:[%s3059_s9 + $0x10] sm:$0xff]  ;;  %v1905_v37 = vld [vmem:[%s3059_s9 + $0x18] sm:$0xff] }
 0x62a   : > { %v2213_v44 = vld [vmem:[%s3057_s7] ss:$0 sm:$0xff] }
 0x62b   : > { %v1643_v45 = vrot.slane %v1635_v38, %v2756_v41  ;;  %v1650_v46 = vrot.slane %v1636_v39, %v2756_v41  ;;  %v1659_v47 = vrot.slane %v1651_v40, %v2756_v41  ;;  %v1666_v48 = vrot.slane %v1652_v42, %v2756_v41 }
 0x62c   : > { %v2396_v38 = vpack.c.bf16 %v1905_v37, %v1904_v36 }
 0x62d   : > { %v1667_v29 = vcombine.low %v1643_v45, %v1659_v47  ;;  %v1668_v30 = vcombine.high %v1643_v45, %v1659_v47  ;;  %v1683_v49 = vcombine.low %v1650_v46, %v1666_v48  ;;  %v1684_v28 = vcombine.high %v1650_v46, %v1666_v48  ;;  %v2214_v46 = vld [vmem:[%s3058_s8] ss:$0 sm:$0xff] }
 0x62f   : > { %v1675_v53 = vrot.slane %v1667_v29, %v2766_v50  ;;  %v1682_v54 = vrot.slane %v1668_v30, %v2766_v50  ;;  %v1691_v55 = vrot.slane %v1683_v49, %v2766_v50  ;;  %v1698_v56 = vrot.slane %v1684_v28, %v2766_v50  ;;  %v2013_v29 = vld [vmem:[%s3061_s11] sm:$0xff]  ;;  %v2014_v30 = vld [vmem:[%s3061_s11 + $0x8] sm:$0xff]  ;;  %v2015_v28 = vld [vmem:[%s3061_s11 + $0x10] sm:$0xff] }
 0x630   : > { %v2399_v49 = vpack.c.bf16 %v2014_v30, %v2013_v29  ;;  %v2402_v52 = vpack.c.bf16 %v2016_v51, %v2015_v28 }
 0x631   : > { %v1703_v58 = vcombine.low %v1675_v53, %v1682_v54  ;;  %v2209_v59 = vcombine.high %v1675_v53, %v1682_v54  ;;  %v1719_v60 = vcombine.low %v1691_v55, %v1698_v56  ;;  %v2210_v61 = vcombine.high %v1691_v55, %v1698_v56  ;;  %v2017_v53 = vld [vmem:[%s3061_s11 + $0x20] sm:$0xff]  ;;  %v2018_v54 = vld [vmem:[%s3061_s11 + $0x28] sm:$0xff]  ;;  %v2019_v56 = vld [vmem:[%s3061_s11 + $0x30] sm:$0xff] }
 0x632   : > { %2400 = vmatpush3.bf16.msra.mxu0 %v2399_v49  ;;  %v2405_v55 = vpack.c.bf16 %v2018_v54, %v2017_v53 }
 0x633   : > { %v1710_v62 = vrot.slane %v1703_v58, %v2756_v41  ;;  %v1718_v63 = vrot.slane %v2209_v59, %v2756_v41  ;;  %v1726_v1 = vrot.slane %v1719_v60, %v2756_v41  ;;  %v1734_v2 = vrot.slane %v2210_v61, %v2756_v41  ;;  %2401 = vmatprep.subr.bf16.mxu0 %v2562_v10  ;;  %v2021_v59 = vld [vmem:[%s3061_s11 + $0x40] sm:$0xff]  ;;  %v2022_v60 = vld [vmem:[%s3061_s11 + $0x48] sm:$0xff] }
 0x634   : > { %v2408_v58 = vpack.c.bf16 %v2020_v57, %v2019_v56  ;;  %v2411_v61 = vpack.c.bf16 %v2022_v60, %v2021_v59 }
 0x635   : > { %v1736_v3 = vcombine.high %v1710_v62, %v1718_v63  ;;  %v1752_v4 = vcombine.high %v1726_v1, %v1734_v2  ;;  %v1735_v5 = vcombine.low %v1710_v62, %v1718_v63  ;;  %v1751_v6 = vcombine.low %v1726_v1, %v1734_v2  ;;  %v2023_v62 = vld [vmem:[%s3061_s11 + $0x50] sm:$0xff]  ;;  %v2024_v63 = vld [vmem:[%s3061_s11 + $0x58] sm:$0xff]  ;;  %v2025_v2 = vld [vmem:[%s3061_s11 + $0x60] sm:$0xff] }
 0x636   : > { %2403 = vmatpush3.bf16.msra.mxu0 %v2402_v52  ;;  %v2414_v1 = vpack.c.bf16 %v2024_v63, %v2023_v62 }
 0x637   : > { %v1750_v7 = vrot.slane %v1736_v3, %v2766_v50  ;;  %v1766_v8 = vrot.slane %v1752_v4, %v2766_v50  ;;  %v1743_v9 = vrot.slane %v1735_v5, %v2766_v50  ;;  %v1759_v11 = vrot.slane %v1751_v6, %v2766_v50  ;;  %v2211_v50 = vld [vmem:[%s3056_s6] ss:$0 sm:$0xff]  ;;  %2404 = vmatprep.subr.bf16.mxu0 %v2562_v10  ;;  %v2026_v3 = vld [vmem:[%s3061_s11 + $0x68] sm:$0xff]  ;;  %v2027_v5 = vld [vmem:[%s3061_s11 + $0x70] sm:$0xff] }
 0x638   : > { %v2417_v4 = vpack.c.bf16 %v2026_v3, %v2025_v2  ;;  %v2028_v6 = vld [vmem:[%s3061_s11 + $0x78] sm:$0xff] }
 0x639   : > { %v1769_v12 = vcombine.low %v1750_v7, %v1766_v8  ;;  %v1768_v14 = vcombine.high %v1743_v9, %v1759_v11  ;;  %v1770_v15 = vcombine.high %v1750_v7, %v1766_v8  ;;  %v1767_v16 = vcombine.low %v1743_v9, %v1759_v11  ;;  %v2215_v8 = vld [vmem:[%s3060_s10] ss:$0 sm:$0xff] }
 0x63a   : > { %2406 = vmatpush3.bf16.msra.mxu0 %v2405_v55  ;;  %v2420_v7 = vpack.c.bf16 %v2028_v6, %v2027_v5 }
 0x63b   : > { %1776 = vrot.lane.b32.xlu1 %v1769_v12, %s2572_s20  ;;  %1772 = vrot.lane.b32.xlu0 %v1768_v14, %s2573_s21  ;;  %s431_s20 = scalar_lea.vmem [#allocation2], %s2185_s24  ;;  %s2575_s24 = smov [#allocation2]  }
 0x63c   : > { %2407 = vmatprep.subr.bf16.mxu0 %v2562_v10  ;;  %s2122_s21 = sshll.u32 %s431_s20, 4  ;;  %s2502_s15 = sshll.u32 %s2575_s24, 4  ;;  %s3009_s21 = int_to_ptr.vmem [resolvable:$true] %s2122_s21  ;;  %s2503_s15 = int_to_ptr.vmem [resolvable:$false] %s2502_s15 }
 0x63d   : > { %s2498_s29 = scalar_lea.vmem %s3009_s21, 128  ;;  %s2504_s2 = scalar_lea.vmem %s2503_s15, 256 }
 0x63e   : > { %2409 = vmatpush3.bf16.msra.mxu0 %v2408_v58  ;;  %p2499_p11 = scmp.ne.s32.totalorder %s3009_s21, %s2498_s29  ;;  %p2505_p0 = scmp.lt.s32.totalorder %s3009_s21, %s2503_s15 }
 0x63f   : > { %1780 = vrot.lane.b32.xlu0 %v1770_v15, %s2574_s22  ;;  %2410 = vmatprep.subr.bf16.mxu0 %v2562_v10  ;;  %p2506_p1 = scmp.lt.s32.totalorder %s2504_s2, %s2498_s29 }
 0x640   : > { %p2500_p12 = pnand %p2499_p11, %p2684_p5 }
 0x641   : > { %p2507_p2 = por %p2506_p1, %p2505_p0 }
 0x642   : > { %2412 = vmatpush3.bf16.msra.mxu0 %v2411_v61  ;;  %p2501_p13 = pneg %p2500_p12 }
 0x643   : > { %2413 = vmatprep.subr.bf16.mxu0 %v2562_v10 }
 0x644   : > { %p2508_p3 = pnand %p2507_p2, %p2501_p13 }
 0x646   : > { %2415 = vmatpush3.bf16.msra.mxu0 %v2414_v1 }
 0x647   : > { %2416 = vmatprep.subr.bf16.mxu0 %v2562_v10 }
 0x64a   : > { %2418 = vmatpush3.bf16.msra.mxu0 %v2417_v4 }
 0x64b   : > { %2419 = vmatprep.subr.bf16.mxu0 %v2562_v10 }
 0x64e   : > { %2421 = vmatpush3.bf16.msra.mxu0 %v2420_v7 }
 0x6ad   : > { %v1773_v41 = vpop.permute.xlu0 %1772  ;;  %v1777_v17 = vpop.permute.xlu1 %1776 }
 0x6ae   : > { %v1783_v18 = vsel %vm994_vm2, %v1767_v16, %v1773_v41 }
 0x6af   : > { %v1785_v20 = vsel %vm1784_vm3, %v1783_v18, %v1777_v17 }
 0x6b1   : > { %v1781_v19 = vpop.permute.xlu0 %1780 }
 0x6b2   : > { %v1787_v21 = vsel %vm1786_vm4, %v1785_v20, %v1781_v19 }
 0x6b3   : > { %2332 = vmatmul.mubr.msk.f32.vlgmr.msra.gmra.mrb[12].mxu1 %vm439_vm0, %v1787_v21 }
 0x6b4   : > { %2342 = vmatprep.mubr.msk.f32.mxu1 %vm2563_vm1, %v2564_v13 }
 0x786   : > { %v1868_v22 = vpop.f32.mrb[12].mxu1 }
 0x787   : > { %v1869_v23 = vadd.f32 %v2211_v50, %v1868_v22  ;;  %v2333_v24 = vpop.f32.mrb[13].mxu1 }
 0x789   : > { %v2914_v26 = vadd.f32 %v1869_v23, %v2699_v0  ;;  %v1903_v0 = vld [vmem:[%s3059_s9 + $0x8] sm:$0xff] }
 0x78a   : > { %v2393_v35 = vpack.c.bf16 %v1903_v0, %v1902_v34 }
 0x78b   : > { %v1875_v25 = vsel %vm439_vm0, %v2914_v26, 0.0 }
 0x78c   : > { %1876 = vadd.xlane.f32.xlu1 %v1875_v25  ;;  %2394 = vmatpush3.bf16.msra.mxu1 %v2393_v35 }
 0x78d   : > { %2395 = vmatprep.subr.bf16.mxu1 %v2562_v10 }
 0x790   : > { %2397 = vmatpush3.bf16.msra.mxu1 %v2396_v38  ;;  %v2219_v38 = vld [vmem:[%s3062_s12] ss:$0 sm:$0xff] }
 0x819   : > { %v1877_v27 = vpop.xlane.xlu1 %1876 }
 0x81a   : > { %v1878_v31 = vmul.f32 0.03125, %v1877_v27 }
 0x81c   : > { %v1879_v32 = vsub.f32 %v2914_v26, %v1878_v31 }
 0x81e   : > { %v1880_v33 = vmul.f32 %v1879_v32, %v1879_v32 }
 0x820   : > { %v1881_v13 = vsel %vm439_vm0, %v1880_v33, 0.0 }
 0x821   : > { %1882 = vadd.xlane.f32.xlu0 %v1881_v13 }
 0x8ae   : > { %v1883_v39 = vpop.xlane.xlu0 %1882 }
 0x8af   : > { %v1884_v40 = vmul.f32 0.03125, %v1883_v39 }
 0x8b1   : > { %v1885_v42 = vadd.f32 1e-05, %v1884_v40 }
 0x8b3   : > { %2492 = vrsqrt.f32 %v1885_v42 }
 0x8bd   : > { %v2493_v43 = vpop.eup %2492 }
 0x8be   : > { %v1887_v45 = vmul.f32 %v2493_v43, %v1879_v32 }
 0x8c0   : > { %v1894_v47 = vmul.f32 %v2213_v44, %v1887_v45 }
 0x8c2   : > { %v1901_v48 = vadd.f32 %v2214_v46, %v1894_v47 }
 0x8c4   : > { %2343 = vmatmul.mubr.msk.f32.vlgmr.msra.gmra.mrb[14].mxu1 %vm439_vm0, %v1901_v48 }
 0x997   : > { %v1982_v9 = vpop.f32.mrb[14].mxu1 }
 0x998   : > { %v1983_v11 = vadd.f32 %v2215_v8, %v1982_v9  ;;  %v2344_v12 = vpop.f32.mrb[15].mxu1 }
 0x99a   : > { %v1987_v14 = vmul.f32 0.70710677, %v1983_v11  ;;  %v1986_v35 = vmul.f32 0.5, %v1983_v11 }
 0x99c   : > { %v1988_v15 = vand.u32 2147483647, %v1987_v14  ;;  %vm2008_vm5 = vcmp.lt.f32.partialorder %v1987_v14, 0.0 }
 0x99e   : > { %v1989_v10 = vmul.f32 0.3275911, %v1988_v15  ;;  %v2002_v41 = vsub.f32 0.0, %v1988_v15 }
 0x9a0   : > { %v1990_v16 = vadd.f32 1.0, %v1989_v10  ;;  %v2003_v18 = vmul.f32 %v2002_v41, %v1988_v15 }
 0x9a2   : > { %2494 = vrcp.f32 %v1990_v16  ;;  %v2004_v21 = vmul.f32 1.442695, %v2003_v18 }
 0x9a4   : > { %2496 = vpow2.f32 %v2004_v21 }
 0x9ac   : > { %v2495_v17 = vpop.eup %2494 }
 0x9ad   : > { %v1993_v19 = vmul.f32 1.0614054, %v2495_v17 }
 0x9ae   : > { %v2497_v32 = vpop.eup %2496 }
 0x9af   : > { %v2217_v20 = vadd.f32 -1.4531521, %v1993_v19 }
 0x9b1   : > { %v1995_v50 = vmul.f32 %v2495_v17, %v2217_v20 }
 0x9b3   : > { %v1996_v22 = vadd.f32 1.4214138, %v1995_v50 }
 0x9b5   : > { %v1997_v23 = vmul.f32 %v2495_v17, %v1996_v22 }
 0x9b7   : > { %v2218_v24 = vadd.f32 -0.28449672, %v1997_v23 }
 0x9b9   : > { %v1999_v25 = vmul.f32 %v2495_v17, %v2218_v24 }
 0x9bb   : > { %v2000_v27 = vadd.f32 0.2548296, %v1999_v25 }
 0x9bd   : > { %v2001_v31 = vmul.f32 %v2495_v17, %v2000_v27 }
 0x9bf   : > { %v2006_v33 = vmul.f32 %v2497_v32, %v2001_v31 }
 0x9c1   : > { %v2007_v13 = vsub.f32 1.0, %v2006_v33 }
 0x9c3   : > { %v2009_v34 = vsub.f32 0.0, %v2007_v13 }
 0x9c5   : > { %v2010_v0 = vsel %vm2008_vm5, %v2009_v34, %v2007_v13 }
 0x9c6   : > { %v2011_v36 = vadd.f32 1.0, %v2010_v0 }
 0x9c8   : > { %v2012_v37 = vmul.f32 %v2011_v36, %v1986_v35 }
 0x9ca   : > { %2378 = vmatmul.mubr.f32.vlgmr.msra.gmra.mrb[6].mxu0 %v2012_v37 }
 0xa9d   : > { %v2102_v39 = vpop.f32.mrb[6].mxu0 }
 0xa9e   : > { %v2103_v40 = vadd.f32 %v2219_v38, %v2102_v39  ;;  %v2379_v42 = vpop.f32.mrb[7].mxu0 }
 0xaa0   : > { %v2106_v43 = vadd.f32 %v2103_v40, %v2914_v26 }
 0xaa2   : > { %2107 = vst.msk [vmem:[%s431_s20] sm:$0xff] %vm439_vm0, %v2106_v43 }
 0xaa3   : > { %2511 = shalt.err (!%p2508_p3)
}
 0xaa4   : > { %s2512_s0 = scalar_lea.hbm %s3007_s1, 128  ;;  %s2516_s20 = scalar_lea.hbm %s3063_s13, 256 }
 0xaa5   : > { %p2513_p4 = scmp.ne.s32.totalorder %s3007_s1, %s2512_s0  ;;  %p2517_p9 = scmp.lt.u32.totalorder %s3007_s1, %s3063_s13 }
 0xaa6   : > { %p2518_p10 = scmp.lt.u32.totalorder %s2516_s20, %s2512_s0  ;;  %p2520_p12 = scmp.lt.u32.totalorder %s2512_s0, %s3007_s1 }
 0xaa7   : > { %p2514_p7 = pnand %p2513_p4, %p2684_p5 }
 0xaa8   : > { %p2519_p11 = por %p2518_p10, %p2517_p9 }
 0xaa9   : > { %p2515_p8 = pneg %p2514_p7 }
 0xaaa   : > { %p2521_p13 = por %p2520_p12, %p2519_p11 }
 0xaac   : > { %p2522_p0 = pnand %p2521_p13, %p2515_p8 }
 0xaae   : > { %2525 = shalt.err (!%p2522_p0)
}
 0xaaf   : > { %2422 = dma.vmem_to_hbm [thread:$0]  (%p2684_p5), %s3009_s21, 128, %s3007_s1, %s2109_s30  }
 0xab0 PF: > { %p2428_p1 = scmp.ge.s32.totalorder %s2560_s28, 2  ;;  %s2134_s2 = sand.u32 1, %s2548_s25  }
 0xab1   : > { %s2135_s29 = scalar_lea.sflag [#allocation3], %s2134_s2 }
 0xab2   : > { %p2425_p2 = pnand %p2428_p1, %p2688_p6 }
 0xab4   : > { %2543 = dma.done.wait (!%p2425_p2), %s2135_s29, 128  }
 0xab5   : > { %2545 = vsyncadd (!%p2425_p2), %s2135_s29, 4294967168  ;;  %p23_p3 = scmp.ge.s32.totalorder %s2671_s14, 4   ;;  %s3072_s25 = smov %s2552_s26 }
 0xab6   : > { %s3073_s26 = smov %s2556_s27  ;;  %s3074_s27 = smov %s2682_s17 }
 0xab7   : > { %s3075_s28 = smov %s2671_s14  ;;  %25 = sbr.rel (!%p23_p3) target bundleno = 7 (0x7), region = 107 }
 0xabe   :  { %2140 = vsyncpa [#allocation3], 1 }
 0xabf   :  { %2142 = vsyncpa [#allocation3 + $0x1], 1 }

</bundles_post_ra>
